<compile_context>
chip_gen: v6e
topology: v6e:2x2x1
jax: 0.10.0
libtpu: 0.0.40
codegen_flags: <defaults>
</compile_context>

<pallas_src>
import functools

import jax
import jax.numpy as jnp
from jax.experimental import pallas as pl
from jax.experimental.pallas import tpu as pltpu

_LANE = 128
_SUBLANE = 8


# ----------------------------- Pallas kernel -------------------------------

def _fused_gcn_kernel(*refs, n_layers, true_dims, n_nodes):
    """Fused forward: n_layers GCNConv (+ReLU between) + global mean pool.

    refs = (adj_ref, x_ref, w0_ref, b0_ref, ..., w_{L-1}_ref, b_{L-1}_ref, o_ref)
    All feature dims are padded to 128 lanes; padded weight rows/cols and bias
    lanes are zero, padded adjacency rows/cols are zero, so padded entries never
    contaminate the real rows/cols.  The final pool masks out padded rows and
    divides by the true node count.
    """
    adj_ref, x_ref = refs[0], refs[1]
    o_ref = refs[-1]
    wb_refs = refs[2:-1]

    adj = adj_ref[...]
    h = x_ref[...]

    for i in range(n_layers):
        w = wb_refs[2 * i][...]
        b = wb_refs[2 * i + 1][...]
        f_in, f_out = true_dims[i]
        if f_in < f_out:
            # Pair the N^2 matmul with the narrower feature width: (A @ X) @ W.
            h = jnp.dot(
                jnp.dot(adj, h, preferred_element_type=jnp.float32),
                w, preferred_element_type=jnp.float32)
        else:
            # A @ (X @ W)
            h = jnp.dot(
                adj,
                jnp.dot(h, w, preferred_element_type=jnp.float32),
                preferred_element_type=jnp.float32)
        h = h + b                      # (1, F_pad) broadcasts over node rows
        if i < n_layers - 1:
            h = jnp.maximum(h, 0.0)    # ReLU between layers only

    # global_mean_pool(batch=None): mean over real node rows, keepdims -> (1, C).
    row_ids = jax.lax.broadcasted_iota(jnp.int32, h.shape, 0)
    mask = (row_ids < n_nodes).astype(jnp.float32)
    pooled = jnp.sum(h * mask, axis=0, keepdims=True) * (1.0 / float(n_nodes))
    o_ref[...] = pooled.astype(o_ref.dtype)


# ------------------------------ wrapper ------------------------------------

def _round_up(v, m):
    return ((v + m - 1) // m) * m


def gcn_forward_fused(x, adj, params):
    """Single fused pallas_call for the whole GCNModel forward.

    x:      (N, F_in) node features
    adj:    (N, N) dense normalized adjacency D^-1/2 (A+I) D^-1/2
    params: list of (w, b) per GCNConv layer, w: (F_in_i, F_out_i), b: (F_out_i,)
    returns (1, num_classes)
    """
    n_nodes, f_in0 = x.shape
    n_layers = len(params)
    num_classes = params[-1][0].shape[1]

    # Pad: nodes -> multiple of 8 (sublane), features -> multiple of 128 (lane).
    n_pad = _round_up(max(n_nodes, _SUBLANE), _SUBLANE)
    widest = max([f_in0] + [w.shape[1] for w, _ in params])
    f_pad = _round_up(max(widest, _LANE), _LANE)

    adj_p = jnp.zeros((n_pad, n_pad), jnp.float32)
    adj_p = adj_p.at[:n_nodes, :n_nodes].set(adj.astype(jnp.float32))
    x_p = jnp.zeros((n_pad, f_pad), jnp.float32)
    x_p = x_p.at[:n_nodes, :f_in0].set(x.astype(jnp.float32))

    flat_inputs = [adj_p, x_p]
    true_dims = []
    for w, b in params:
        fi, fo = w.shape
        true_dims.append((fi, fo))
        w_p = jnp.zeros((f_pad, f_pad), jnp.float32).at[:fi, :fo].set(
            w.astype(jnp.float32))
        b_p = jnp.zeros((1, f_pad), jnp.float32).at[0, :fo].set(
            b.astype(jnp.float32))
        flat_inputs += [w_p, b_p]

    kernel = functools.partial(
        _fused_gcn_kernel,
        n_layers=n_layers,
        true_dims=tuple(true_dims),
        n_nodes=n_nodes,
    )
    vmem = pl.BlockSpec(memory_space=pltpu.MemorySpace.VMEM)

    out_padded = pl.pallas_call(
        kernel,
        out_shape=jax.ShapeDtypeStruct((1, f_pad), jnp.float32),
        in_specs=[vmem] * len(flat_inputs),
        out_specs=vmem,
        compiler_params=pltpu.CompilerParams(vmem_limit_bytes=32 * 1024 * 1024),
    )(*flat_inputs)

    return out_padded[:, :num_classes]


@jax.jit
def gcn_model_forward(x, adj, params):
    """GCNModel.forward: stacked GCNConv + ReLU, then global mean pool (keepdim)."""
    return gcn_forward_fused(x, adj, params)


# ------------------------------ JAX glue -----------------------------------

def build_normalized_adjacency(edge_index, num_nodes):
    """Dense D^{-1/2} (A + I) D^{-1/2} as in GCNConv's gcn_norm (add self loops)."""
    src = edge_index[0]
    dst = edge_index[1]
    # messages flow source -> target; aggregation happens at the target node.
    adj = jnp.zeros((num_nodes, num_nodes), jnp.float32).at[dst, src].add(1.0)
    # add_remaining_self_loops: only add a self-loop where one is missing.
    diag = jnp.diagonal(adj)
    adj = adj + jnp.diag(jnp.where(diag == 0.0, 1.0, 0.0))
    deg = adj.sum(axis=1)
    d_inv_sqrt = jnp.where(deg > 0, jax.lax.rsqrt(deg), 0.0)
    return d_inv_sqrt[:, None] * adj * d_inv_sqrt[None, :]


def init_gcn_params(key, in_channels, hidden_channels, out_channels, n_layers):
    """Deterministic glorot-uniform weights + zero biases for each GCNConv layer."""
    dims = [in_channels] + [hidden_channels] * (n_layers - 1) + [out_channels]
    params = []
    keys = jax.random.split(key, n_layers)
    for i in range(n_layers):
        fan_in, fan_out = dims[i], dims[i + 1]
        limit = jnp.sqrt(6.0 / (fan_in + fan_out))
        w = jax.random.uniform(keys[i], (fan_in, fan_out), jnp.float32,
                               minval=-limit, maxval=limit)
        b = jnp.zeros((fan_out,), jnp.float32)
        params.append((w, b))
    return params


def reference_forward(x, adj, params):
    """Pure-JAX reference of the same forward (for a correctness check)."""
    h = x
    hp = jax.lax.Precision.HIGHEST
    for i, (w, b) in enumerate(params):
        h = jnp.dot(adj, jnp.dot(h, w, precision=hp), precision=hp) + b
        if i < len(params) - 1:
            h = jnp.maximum(h, 0.0)
    return jnp.mean(h, axis=0, keepdims=True)


# -------------------------------- main --------------------------------------

if __name__ == "__main__":
    # Small synthetic "dataset" consistent with the module config:
    #   num_features=4, hidden_channels=32, num_classes=3, n_layers=3, N=16 nodes.
    num_nodes = 16
    in_channels = 4
    hidden_channels = 32
    num_classes = 3
    n_layers = 3

    key = jax.random.PRNGKey(0)
    k_x, k_w = jax.random.split(key)

    x = jax.random.normal(k_x, (num_nodes, in_channels), jnp.float32)

    # Deterministic ring graph, edges in both directions.
    src = jnp.arange(num_nodes, dtype=jnp.int32)
    dst = (src + 1) % num_nodes
    edge_index = jnp.stack(
        [jnp.concatenate([src, dst]), jnp.concatenate([dst, src])], axis=0
    )

    adj = build_normalized_adjacency(edge_index, num_nodes)
    params = init_gcn_params(k_w, in_channels, hidden_channels, num_classes, n_layers)

    out = gcn_model_forward(x, adj, params)
    out = jax.block_until_ready(out)

    assert out.shape == (1, num_classes), out.shape
    assert out.dtype == jnp.float32
    assert bool(jnp.all(jnp.isfinite(out)))

    ref = reference_forward(x, adj, params)
    assert bool(jnp.allclose(out, ref, rtol=1e-3, atol=1e-3)), (out, ref)

    print("KERNEL_OK")
</pallas_src>

<mosaic_0001>
module attributes {stable_mosaic.version = 11 : i64} {
  func.func @_fused_gcn_kernel(%arg0: memref<16x16xf32, #tpu.memory_space<vmem>>, %arg1: memref<16x128xf32, #tpu.memory_space<vmem>>, %arg2: memref<128x128xf32, #tpu.memory_space<vmem>>, %arg3: memref<1x128xf32, #tpu.memory_space<vmem>>, %arg4: memref<128x128xf32, #tpu.memory_space<vmem>>, %arg5: memref<1x128xf32, #tpu.memory_space<vmem>>, %arg6: memref<128x128xf32, #tpu.memory_space<vmem>>, %arg7: memref<1x128xf32, #tpu.memory_space<vmem>>, %arg8: memref<1x128xf32, #tpu.memory_space<vmem>>) attributes {dimension_semantics = [], scalar_prefetch = 0 : i64, scratch_operands = 0 : i64, tpu.core_type = #tpu.core_type<tc>} {
    %c0 = arith.constant 0 : index
    %c0_0 = arith.constant 0 : index
    %0 = vector.load %arg0[%c0, %c0_0] : memref<16x16xf32, #tpu.memory_space<vmem>>, vector<16x16xf32>
    %c0_1 = arith.constant 0 : index
    %c0_2 = arith.constant 0 : index
    %1 = vector.load %arg1[%c0_1, %c0_2] : memref<16x128xf32, #tpu.memory_space<vmem>>, vector<16x128xf32>
    %c0_3 = arith.constant 0 : index
    %c0_4 = arith.constant 0 : index
    %2 = vector.load %arg2[%c0_3, %c0_4] : memref<128x128xf32, #tpu.memory_space<vmem>>, vector<128x128xf32>
    %c0_5 = arith.constant 0 : index
    %c0_6 = arith.constant 0 : index
    %3 = vector.load %arg3[%c0_5, %c0_6] : memref<1x128xf32, #tpu.memory_space<vmem>>, vector<1x128xf32>
    %cst = arith.constant dense<0.000000e+00> : vector<16x128xf32>
    %4 = tpu.matmul %0, %1, %cst {dimension_numbers = #tpu.dot_dimension_numbers<[1], [0], [0], [1], [0, 0, 1, 1], [], []>} : vector<16x16xf32>, vector<16x128xf32>, vector<16x128xf32> -> vector<16x128xf32>
    %cst_7 = arith.constant dense<0.000000e+00> : vector<16x128xf32>
    %5 = tpu.matmul %4, %2, %cst_7 {dimension_numbers = #tpu.dot_dimension_numbers<[1], [0], [0], [1], [0, 0, 1, 1], [], []>} : vector<16x128xf32>, vector<128x128xf32>, vector<16x128xf32> -> vector<16x128xf32>
    %6 = vector.broadcast %3 : vector<1x128xf32> to vector<16x128xf32>
    %7 = arith.addf %5, %6 : vector<16x128xf32>
    %cst_8 = arith.constant 0.000000e+00 : f32
    %8 = vector.broadcast %cst_8 : f32 to vector<16x128xf32>
    %9 = arith.maximumf %7, %8 : vector<16x128xf32>
    %c0_9 = arith.constant 0 : index
    %c0_10 = arith.constant 0 : index
    %10 = vector.load %arg4[%c0_9, %c0_10] : memref<128x128xf32, #tpu.memory_space<vmem>>, vector<128x128xf32>
    %c0_11 = arith.constant 0 : index
    %c0_12 = arith.constant 0 : index
    %11 = vector.load %arg5[%c0_11, %c0_12] : memref<1x128xf32, #tpu.memory_space<vmem>>, vector<1x128xf32>
    %cst_13 = arith.constant dense<0.000000e+00> : vector<16x128xf32>
    %12 = tpu.matmul %9, %10, %cst_13 {dimension_numbers = #tpu.dot_dimension_numbers<[1], [0], [0], [1], [0, 0, 1, 1], [], []>} : vector<16x128xf32>, vector<128x128xf32>, vector<16x128xf32> -> vector<16x128xf32>
    %cst_14 = arith.constant dense<0.000000e+00> : vector<16x128xf32>
    %13 = tpu.matmul %0, %12, %cst_14 {dimension_numbers = #tpu.dot_dimension_numbers<[1], [0], [0], [1], [0, 0, 1, 1], [], []>} : vector<16x16xf32>, vector<16x128xf32>, vector<16x128xf32> -> vector<16x128xf32>
    %14 = vector.broadcast %11 : vector<1x128xf32> to vector<16x128xf32>
    %15 = arith.addf %13, %14 : vector<16x128xf32>
    %cst_15 = arith.constant 0.000000e+00 : f32
    %16 = vector.broadcast %cst_15 : f32 to vector<16x128xf32>
    %17 = arith.maximumf %15, %16 : vector<16x128xf32>
    %c0_16 = arith.constant 0 : index
    %c0_17 = arith.constant 0 : index
    %18 = vector.load %arg6[%c0_16, %c0_17] : memref<128x128xf32, #tpu.memory_space<vmem>>, vector<128x128xf32>
    %c0_18 = arith.constant 0 : index
    %c0_19 = arith.constant 0 : index
    %19 = vector.load %arg7[%c0_18, %c0_19] : memref<1x128xf32, #tpu.memory_space<vmem>>, vector<1x128xf32>
    %cst_20 = arith.constant dense<0.000000e+00> : vector<16x128xf32>
    %20 = tpu.matmul %17, %18, %cst_20 {dimension_numbers = #tpu.dot_dimension_numbers<[1], [0], [0], [1], [0, 0, 1, 1], [], []>} : vector<16x128xf32>, vector<128x128xf32>, vector<16x128xf32> -> vector<16x128xf32>
    %cst_21 = arith.constant dense<0.000000e+00> : vector<16x128xf32>
    %21 = tpu.matmul %0, %20, %cst_21 {dimension_numbers = #tpu.dot_dimension_numbers<[1], [0], [0], [1], [0, 0, 1, 1], [], []>} : vector<16x16xf32>, vector<16x128xf32>, vector<16x128xf32> -> vector<16x128xf32>
    %22 = vector.broadcast %19 : vector<1x128xf32> to vector<16x128xf32>
    %23 = arith.addf %21, %22 : vector<16x128xf32>
    %24 = tpu.iota {dimensions = array<i32: 0>} : vector<16x128xi32>
    %c16_i32 = arith.constant 16 : i32
    %25 = vector.broadcast %c16_i32 : i32 to vector<16x128xi32>
    %26 = arith.cmpi slt, %24, %25 : vector<16x128xi32>
    %27 = arith.extui %26 : vector<16x128xi1> to vector<16x128xi32>
    %28 = arith.sitofp %27 : vector<16x128xi32> to vector<16x128xf32>
    %29 = arith.mulf %23, %28 : vector<16x128xf32>
    %cst_22 = arith.constant dense<0.000000e+00> : vector<128xf32>
    %30 = vector.multi_reduction <add>, %29, %cst_22 [0] : vector<16x128xf32> to vector<128xf32>
    %31 = vector.shape_cast %30 : vector<128xf32> to vector<1x128xf32>
    %cst_23 = arith.constant 6.250000e-02 : f32
    %32 = vector.broadcast %cst_23 : f32 to vector<1x128xf32>
    %33 = arith.mulf %31, %32 : vector<1x128xf32>
    %c0_24 = arith.constant 0 : index
    %c0_25 = arith.constant 0 : index
    %34 = vector.load %arg8[%c0_24, %c0_25] : memref<1x128xf32, #tpu.memory_space<vmem>>, vector<1x128xf32>
    tpu.vector_store %arg8[%c0_24, %c0_25], %33 {strides = array<i32>} : memref<1x128xf32, #tpu.memory_space<vmem>>, vector<1x128xf32>,
    return
  }
}

</mosaic_0001>

<bundles_post_ra>
// kernel: gcn_model_forward.1
= control target key start
LH: loop header
LB: loop body
LE: loop exit
PB: predicated region body
PF: predicated region fallthrough
CT: control target
= control target key end

     0   :  { %vm51_vm0 = vcmask 130048   ;;  %s1052_s0 = inlined_call_operand.vmem [shape: f32[16,16], index: 0, kind: input, shape index: {}]   ;;  %s1053_s1 = inlined_call_operand.vmem [shape: f32[16,128], index: 1, kind: input, shape index: {}]   ;;  %s1054_s2 = inlined_call_operand.vmem [shape: f32[128,128], index: 2, kind: input, shape index: {}]   ;;  %s1055_s3 = inlined_call_operand.vmem [shape: f32[1,128], index: 3, kind: input, shape index: {}]   ;;  %s1056_s4 = inlined_call_operand.vmem [shape: f32[128,128], index: 4, kind: input, shape index: {}]   ;;  %s1057_s5 = inlined_call_operand.vmem [shape: f32[1,128], index: 5, kind: input, shape index: {}]   ;;  %s1058_s6 = inlined_call_operand.vmem [shape: f32[128,128], index: 6, kind: input, shape index: {}]   ;;  %s1059_s7 = inlined_call_operand.vmem [shape: f32[1,128], index: 7, kind: input, shape index: {}]   ;;  %s1060_s8 = inlined_call_operand.hbm [shape: f32[1,128], index: 8, kind: output, shape index: {}]  }
   0x1   :  { %v33_v0 = vld [vmem:[%s1053_s1 + $0x8] sm:$0xff]  ;;  %v32_v1 = vld [vmem:[%s1053_s1] sm:$0xff]  ;;  %v49_v4 = vld [vmem:[%s1054_s2 + $0x78] sm:$0xff] }
   0x2   :  { %v877_v2 = vld [vmem:[%s1052_s0] sm:$0xff]  ;;  %673 = vmatprep.subr.mxu1 %v33_v0  ;;  %v884_v3 = vld [vmem:[%s1052_s0 + $0x8] sm:$0xff]  ;;  %v48_v5 = vld [vmem:[%s1054_s2 + $0x70] sm:$0xff] }
   0x3   :  { %677 = vmatprep.mubr.msk.f32.mxu1 %vm51_vm0, %v877_v2  ;;  %674 = vmatpush3.msra.mxu1 %v33_v0  ;;  %v47_v6 = vld [vmem:[%s1054_s2 + $0x68] sm:$0xff] }
   0x4   :  { %675 = vmatprep.subr.mxu1 %v32_v1 }
   0x5   :  { %676 = vmatpush3.msra.mxu1 %v32_v1 }
   0x6   :  { %678 = vmatmul.mubr.msk.f32.vlgmr.msra.gmra.mxu1 %vm51_vm0, %v884_v3  ;;  %680 = vmatprep.subr.mxu1 %v49_v4 }
   0x7   :  { %681 = vmatpush3.msra.mxu1 %v49_v4 }
   0x8   :  { %13 = vsyncpa [#allocation3], 0  ;;  %682 = vmatprep.subr.mxu1 %v48_v5  ;;  %v46_v7 = vld [vmem:[%s1054_s2 + $0x60] sm:$0xff]  ;;  %v45_v8 = vld [vmem:[%s1054_s2 + $0x58] sm:$0xff]  ;;  %s822_s10 = smov [#allocation2]  }
   0x9   :  { %683 = vmatpush3.msra.mxu1 %v48_v5  ;;  %v44_v9 = vld [vmem:[%s1054_s2 + $0x50] sm:$0xff]  ;;  %v43_v10 = vld [vmem:[%s1054_s2 + $0x48] sm:$0xff]  ;;  %v42_v11 = vld [vmem:[%s1054_s2 + $0x40] sm:$0xff]  ;;  %s590_s11 = sshll.u32 %s822_s10, 4  ;;  %s591_s11 = int_to_ptr.vmem [resolvable:$true] %s590_s11 }
   0xa   :  { %684 = vmatprep.subr.mxu1 %v47_v6  ;;  %v41_v12 = vld [vmem:[%s1054_s2 + $0x38] sm:$0xff]  ;;  %v40_v13 = vld [vmem:[%s1054_s2 + $0x30] sm:$0xff]  ;;  %v39_v14 = vld [vmem:[%s1054_s2 + $0x28] sm:$0xff]  ;;  %s800_s12 = scalar_lea.vmem %s591_s11, 16  ;;  %s804_s13 = scalar_lea.vmem %s591_s11, 32 }
   0xb   :  { %685 = vmatpush3.msra.mxu1 %v47_v6  ;;  %v38_v15 = vld [vmem:[%s1054_s2 + $0x20] sm:$0xff]  ;;  %v37_v16 = vld [vmem:[%s1054_s2 + $0x18] sm:$0xff]  ;;  %v36_v17 = vld [vmem:[%s1054_s2 + $0x10] sm:$0xff]  ;;  %p801_p0 = scmp.ne.s32.totalorder %s591_s11, %s800_s12  ;;  %p805_p1 = scmp.lt.s32.totalorder %s591_s11, %s591_s11 }
   0xc   :  { %686 = vmatprep.subr.mxu1 %v46_v7  ;;  %v35_v18 = vld [vmem:[%s1054_s2 + $0x8] sm:$0xff]  ;;  %v34_v19 = vld [vmem:[%s1054_s2] sm:$0xff]  ;;  %v231_v20 = vld [vmem:[%s1056_s4 + $0x78] sm:$0xff]  ;;  %p806_p2 = scmp.lt.s32.totalorder %s804_s13, %s800_s12 }
   0xd   :  { %687 = vmatpush3.msra.mxu1 %v46_v7  ;;  %v230_v21 = vld [vmem:[%s1056_s4 + $0x70] sm:$0xff]  ;;  %715 = vmatprep.subr.mxu0 %v231_v20  ;;  %v229_v22 = vld [vmem:[%s1056_s4 + $0x68] sm:$0xff]  ;;  %v228_v23 = vld [vmem:[%s1056_s4 + $0x60] sm:$0xff] }
   0xe   :  { %688 = vmatprep.subr.mxu1 %v45_v8  ;;  %716 = vmatpush3.msra.mxu0 %v231_v20  ;;  %v227_v24 = vld [vmem:[%s1056_s4 + $0x58] sm:$0xff]  ;;  %v226_v25 = vld [vmem:[%s1056_s4 + $0x50] sm:$0xff]  ;;  %v225_v26 = vld [vmem:[%s1056_s4 + $0x48] sm:$0xff]  ;;  %p807_p3 = por %p806_p2, %p805_p1 }
   0xf   :  { %689 = vmatpush3.msra.mxu1 %v45_v8  ;;  %717 = vmatprep.subr.mxu0 %v230_v21  ;;  %v224_v27 = vld [vmem:[%s1056_s4 + $0x40] sm:$0xff]  ;;  %v223_v28 = vld [vmem:[%s1056_s4 + $0x38] sm:$0xff]  ;;  %v222_v29 = vld [vmem:[%s1056_s4 + $0x30] sm:$0xff] }
  0x10   :  { %690 = vmatprep.subr.mxu1 %v44_v9  ;;  %718 = vmatpush3.msra.mxu0 %v230_v21  ;;  %v221_v30 = vld [vmem:[%s1056_s4 + $0x28] sm:$0xff]  ;;  %v220_v31 = vld [vmem:[%s1056_s4 + $0x20] sm:$0xff]  ;;  %v219_v34 = vld [vmem:[%s1056_s4 + $0x18] sm:$0xff]  ;;  %p808_p4 = pnand %p807_p3, %p801_p0 }
  0x11   :  { %691 = vmatpush3.msra.mxu1 %v44_v9  ;;  %719 = vmatprep.subr.mxu0 %v229_v22  ;;  %v218_v35 = vld [vmem:[%s1056_s4 + $0x10] sm:$0xff]  ;;  %v217_v36 = vld [vmem:[%s1056_s4 + $0x8] sm:$0xff]  ;;  %v216_v37 = vld [vmem:[%s1056_s4] sm:$0xff] }
  0x12   :  { %692 = vmatprep.subr.mxu1 %v43_v10  ;;  %720 = vmatpush3.msra.mxu0 %v229_v22  ;;  %v600_v38 = vld [vmem:[%s1055_s3] ss:$0 sm:$0xff]  ;;  %v406_v45 = vld [vmem:[%s1058_s6 + $0x78] sm:$0xff]  ;;  %v405_v46 = vld [vmem:[%s1058_s6 + $0x70] sm:$0xff] }
  0x13   :  { %693 = vmatpush3.msra.mxu1 %v43_v10  ;;  %721 = vmatprep.subr.mxu0 %v228_v23  ;;  %v404_v47 = vld [vmem:[%s1058_s6 + $0x68] sm:$0xff]  ;;  %v403_v48 = vld [vmem:[%s1058_s6 + $0x60] sm:$0xff]  ;;  %v402_v49 = vld [vmem:[%s1058_s6 + $0x58] sm:$0xff] }
  0x14   :  { %694 = vmatprep.subr.mxu1 %v42_v11  ;;  %722 = vmatpush3.msra.mxu0 %v228_v23  ;;  %v401_v50 = vld [vmem:[%s1058_s6 + $0x50] sm:$0xff]  ;;  %v400_v51 = vld [vmem:[%s1058_s6 + $0x48] sm:$0xff]  ;;  %v399_v52 = vld [vmem:[%s1058_s6 + $0x40] sm:$0xff] }
  0x15   :  { %695 = vmatpush3.msra.mxu1 %v42_v11  ;;  %723 = vmatprep.subr.mxu0 %v227_v24  ;;  %v398_v53 = vld [vmem:[%s1058_s6 + $0x38] sm:$0xff]  ;;  %v397_v54 = vld [vmem:[%s1058_s6 + $0x30] sm:$0xff]  ;;  %v396_v55 = vld [vmem:[%s1058_s6 + $0x28] sm:$0xff] }
  0x16   :  { %696 = vmatprep.subr.mxu1 %v41_v12  ;;  %724 = vmatpush3.msra.mxu0 %v227_v24  ;;  %v395_v56 = vld [vmem:[%s1058_s6 + $0x20] sm:$0xff]  ;;  %v394_v59 = vld [vmem:[%s1058_s6 + $0x18] sm:$0xff]  ;;  %v393_v60 = vld [vmem:[%s1058_s6 + $0x10] sm:$0xff] }
  0x17   :  { %697 = vmatpush3.msra.mxu1 %v41_v12  ;;  %725 = vmatprep.subr.mxu0 %v226_v25  ;;  %v392_v61 = vld [vmem:[%s1058_s6 + $0x8] sm:$0xff]  ;;  %v391_v62 = vld [vmem:[%s1058_s6] sm:$0xff] }
  0x18   :  { %698 = vmatprep.subr.mxu1 %v40_v13  ;;  %726 = vmatpush3.msra.mxu0 %v226_v25  ;;  %v601_v63 = vld [vmem:[%s1057_s5] ss:$0 sm:$0xff] }
  0x19   :  { %699 = vmatpush3.msra.mxu1 %v40_v13  ;;  %727 = vmatprep.subr.mxu0 %v225_v26  ;;  %v604_v10 = vld [vmem:[%s1059_s7] ss:$0 sm:$0xff] }
  0x1a   :  { %700 = vmatprep.subr.mxu1 %v39_v14  ;;  %728 = vmatpush3.msra.mxu0 %v225_v26 }
  0x1b   :  { %701 = vmatpush3.msra.mxu1 %v39_v14  ;;  %729 = vmatprep.subr.mxu0 %v224_v27 }
  0x1c   :  { %702 = vmatprep.subr.mxu1 %v38_v15  ;;  %730 = vmatpush3.msra.mxu0 %v224_v27 }
  0x1d   :  { %703 = vmatpush3.msra.mxu1 %v38_v15  ;;  %731 = vmatprep.subr.mxu0 %v223_v28 }
  0x1e   :  { %704 = vmatprep.subr.mxu1 %v37_v16  ;;  %732 = vmatpush3.msra.mxu0 %v223_v28 }
  0x1f   :  { %705 = vmatpush3.msra.mxu1 %v37_v16  ;;  %733 = vmatprep.subr.mxu0 %v222_v29 }
  0x20   :  { %706 = vmatprep.subr.mxu1 %v36_v17  ;;  %734 = vmatpush3.msra.mxu0 %v222_v29 }
  0x21   :  { %707 = vmatpush3.msra.mxu1 %v36_v17  ;;  %735 = vmatprep.subr.mxu0 %v221_v30 }
  0x22   :  { %708 = vmatprep.subr.mxu1 %v35_v18  ;;  %736 = vmatpush3.msra.mxu0 %v221_v30 }
  0x23   :  { %709 = vmatpush3.msra.mxu1 %v35_v18  ;;  %737 = vmatprep.subr.mxu0 %v220_v31 }
  0x24   :  { %710 = vmatprep.subr.mxu1 %v34_v19  ;;  %738 = vmatpush3.msra.mxu0 %v220_v31 }
  0x25   :  { %711 = vmatpush3.msra.mxu1 %v34_v19  ;;  %739 = vmatprep.subr.mxu0 %v219_v34 }
  0x26   :  { %740 = vmatpush3.msra.mxu0 %v219_v34 }
  0x27   :  { %741 = vmatprep.subr.mxu0 %v218_v35 }
  0x28   :  { %742 = vmatpush3.msra.mxu0 %v218_v35 }
  0x29   :  { %743 = vmatprep.subr.mxu0 %v217_v36 }
  0x2a   :  { %744 = vmatpush3.msra.mxu0 %v217_v36 }
  0x2b   :  { %745 = vmatprep.subr.mxu0 %v216_v37 }
  0x2c   :  { %746 = vmatpush3.msra.mxu0 %v216_v37 }
  0x2d   :  { %757 = vmatprep.subr.mxu0 %v406_v45 }
  0xc6   :  { %v679_v32 = vpop.f32.mrf.mxu1 }
  0xc8   :  { %v124_v33 = vpop.f32.mrf.mxu1 }
  0xc9   :  { %712 = vmatprep.mubr.f32.mxu1 %v124_v33 }
  0xca   :  { %713 = vmatmul.mubr.f32.vlgmr.msra.gmra.mxu1 %v679_v32 }
  0xcb   :  { %754 = vmatprep.mubr.msk.f32.mxu1 %vm51_vm0, %v877_v2 }
 0x18a   :  { %v714_v39 = vpop.f32.mrf.mxu1 }
 0x18b   :  { %v211_v40 = vadd.f32 %v714_v39, %v600_v38 }
 0x18c   :  { %v205_v41 = vpop.f32.mrf.mxu1 }
 0x18d   :  { %v206_v42 = vadd.f32 %v600_v38, %v205_v41  ;;  %v215_v44 = vmax.f32 %v211_v40, 0.0 }
 0x18f   :  { %v214_v43 = vmax.f32 %v206_v42, 0.0 }
 0x191   :  { %747 = vmatprep.mubr.f32.mxu0 %v214_v43 }
 0x192   :  { %748 = vmatmul.mubr.f32.vlgmr.msra.gmra.mxu0 %v215_v44 }
 0x193   :  { %758 = vmatpush3.msra.mxu0 %v406_v45 }
 0x194   :  { %759 = vmatprep.subr.mxu0 %v405_v46 }
 0x195   :  { %760 = vmatpush3.msra.mxu0 %v405_v46 }
 0x196   :  { %761 = vmatprep.subr.mxu0 %v404_v47 }
 0x197   :  { %762 = vmatpush3.msra.mxu0 %v404_v47 }
 0x198   :  { %763 = vmatprep.subr.mxu0 %v403_v48 }
 0x199   :  { %764 = vmatpush3.msra.mxu0 %v403_v48 }
 0x19a   :  { %765 = vmatprep.subr.mxu0 %v402_v49 }
 0x19b   :  { %766 = vmatpush3.msra.mxu0 %v402_v49 }
 0x19c   :  { %767 = vmatprep.subr.mxu0 %v401_v50 }
 0x19d   :  { %768 = vmatpush3.msra.mxu0 %v401_v50 }
 0x19e   :  { %769 = vmatprep.subr.mxu0 %v400_v51 }
 0x19f   :  { %770 = vmatpush3.msra.mxu0 %v400_v51 }
 0x1a0   :  { %771 = vmatprep.subr.mxu0 %v399_v52 }
 0x1a1   :  { %772 = vmatpush3.msra.mxu0 %v399_v52 }
 0x1a2   :  { %773 = vmatprep.subr.mxu0 %v398_v53 }
 0x1a3   :  { %774 = vmatpush3.msra.mxu0 %v398_v53 }
 0x1a4   :  { %775 = vmatprep.subr.mxu0 %v397_v54 }
 0x1a5   :  { %776 = vmatpush3.msra.mxu0 %v397_v54 }
 0x1a6   :  { %777 = vmatprep.subr.mxu0 %v396_v55 }
 0x1a7   :  { %778 = vmatpush3.msra.mxu0 %v396_v55 }
 0x1a8   :  { %779 = vmatprep.subr.mxu0 %v395_v56 }
 0x1a9   :  { %780 = vmatpush3.msra.mxu0 %v395_v56 }
 0x1aa   :  { %781 = vmatprep.subr.mxu0 %v394_v59 }
 0x1ab   :  { %782 = vmatpush3.msra.mxu0 %v394_v59 }
 0x1ac   :  { %783 = vmatprep.subr.mxu0 %v393_v60 }
 0x1ad   :  { %784 = vmatpush3.msra.mxu0 %v393_v60 }
 0x1ae   :  { %785 = vmatprep.subr.mxu0 %v392_v61 }
 0x1af   :  { %786 = vmatpush3.msra.mxu0 %v392_v61 }
 0x1b0   :  { %787 = vmatprep.subr.mxu0 %v391_v62 }
 0x1b1   :  { %788 = vmatpush3.msra.mxu0 %v391_v62 }
 0x252   :  { %v749_v57 = vpop.f32.mrf.mxu0 }
 0x253   :  { %750 = vmatprep.subr.mxu1 %v749_v57 }
 0x254   :  { %v299_v58 = vpop.f32.mrf.mxu0  ;;  %751 = vmatpush3.msra.mxu1 %v749_v57 }
 0x255   :  { %752 = vmatprep.subr.mxu1 %v299_v58 }
 0x256   :  { %753 = vmatpush3.msra.mxu1 %v299_v58 }
 0x257   :  { %755 = vmatmul.mubr.msk.f32.vlgmr.msra.gmra.mxu1 %vm51_vm0, %v884_v3 }
 0x258   :  { %796 = vmatprep.mubr.msk.f32.mxu1 %vm51_vm0, %v877_v2 }
 0x317   :  { %v756_v0 = vpop.f32.mrf.mxu1 }
 0x318   :  { %v386_v1 = vadd.f32 %v756_v0, %v601_v63 }
 0x319   :  { %v380_v2 = vpop.f32.mrf.mxu1 }
 0x31a   :  { %v381_v4 = vadd.f32 %v601_v63, %v380_v2  ;;  %v390_v6 = vmax.f32 %v386_v1, 0.0 }
 0x31c   :  { %v389_v5 = vmax.f32 %v381_v4, 0.0 }
 0x31e   :  { %789 = vmatprep.mubr.f32.mxu0 %v389_v5 }
 0x31f   :  { %790 = vmatmul.mubr.f32.vlgmr.msra.gmra.mxu0 %v390_v6 }
 0x3df   :  { %v791_v7 = vpop.f32.mrf.mxu0 }
 0x3e0   :  { %792 = vmatprep.subr.mxu1 %v791_v7 }
 0x3e1   :  { %v474_v8 = vpop.f32.mrf.mxu0  ;;  %793 = vmatpush3.msra.mxu1 %v791_v7 }
 0x3e2   :  { %794 = vmatprep.subr.mxu1 %v474_v8 }
 0x3e3   :  { %795 = vmatpush3.msra.mxu1 %v474_v8 }
 0x3e4   :  { %797 = vmatmul.mubr.msk.f32.vlgmr.msra.gmra.mxu1 %vm51_vm0, %v884_v3 }
 0x4a4   :  { %v798_v9 = vpop.f32.mrf.mxu1 }
 0x4a5   :  { %v561_v12 = vadd.f32 %v798_v9, %v604_v10 }
 0x4a6   :  { %v555_v11 = vpop.f32.mrf.mxu1 }
 0x4a7   :  { %v556_v13 = vadd.f32 %v604_v10, %v555_v11 }
 0x4a9   :  { %v575_v14 = vadd.f32 %v561_v12, %v556_v13 }
 0x4ab   :  { %v576_v15 = vrot.slane %v575_v14, 4 }
 0x4ad   :  { %v577_v16 = vadd.f32 %v576_v15, %v575_v14 }
 0x4af   :  { %v578_v17 = vrot.slane %v577_v16, 2 }
 0x4b1   :  { %v579_v18 = vadd.f32 %v578_v17, %v577_v16 }
 0x4b3   :  { %v580_v19 = vrot.slane %v579_v18, 1 }
 0x4b5   :  { %v581_v20 = vadd.f32 %v580_v19, %v579_v18 }
 0x4b7   :  { %v582_v21 = vmul.f32 0.0625, %v581_v20 }
 0x4b9   :  { %583 = vst [vmem:[#allocation2] sm:$0x1] %v582_v21 }
 0x4ba   :  { %811 = shalt.err (!%p808_p4)
}
 0x4bb   :  { %593 = dma.vmem_to_hbm [thread:$0]  %s591_s11, 16, %s1060_s8, [#allocation3]  }
 0x4bc   :  { %820 = dma.done.wait [#allocation3], 16  }
 0x4bd   :  { %821 = vsyncadd [#allocation3], 4294967280 }
 0x4be   :  { %597 = vsyncpa [#allocation3], 1 }

</bundles_post_ra>
